<compile_context>
chip_gen: v5e
topology: v5e:2x2
jax: 0.10.0
libtpu: 0.0.40
codegen_flags: <defaults>
</compile_context>

<pallas_src>
import jax
import jax.numpy as jnp
from jax.experimental import pallas as pl
from jax.experimental.pallas import tpu as pltpu


def _round_up(a: int, b: int) -> int:
    return ((a + b - 1) // b) * b


def _make_cve_kernel(max_value: float, eps: float):
    def kernel(x_ref, w1_ref, b1_ref, w2_ref, b2_ref, g_ref, beta_ref, o_ref):
        # x_ref:    (tm, 1)  token values
        # w1_ref:   (1, D)   linear1.weight viewed as a row
        # b1_ref:   (1, D)   linear1.bias
        # w2_ref:   (D, D)   linear2.weight pre-transposed (y = h @ w2_t)
        # b2_ref:   (1, D)   linear2.bias
        # g_ref:    (1, D)   LayerNorm gamma
        # beta_ref: (1, D)   LayerNorm beta
        # o_ref:    (tm, D)  output tile
        x = jnp.minimum(x_ref[...], max_value)            # torch.clamp(max=.)

        # linear1 (in_features == 1): broadcasted outer product + bias, ReLU.
        h = jnp.maximum(x * w1_ref[...] + b1_ref[...], 0.0)          # (tm, D)

        # linear2 on the MXU, f32 accumulation.
        y = jnp.dot(h, w2_ref[...], preferred_element_type=jnp.float32)
        y = y + b2_ref[...]

        # LayerNorm over the feature axis (biased variance).
        mean = jnp.mean(y, axis=-1, keepdims=True)
        var = jnp.mean((y - mean) ** 2, axis=-1, keepdims=True)
        inv = jax.lax.rsqrt(var + eps)
        out = (y - mean) * inv * g_ref[...] + beta_ref[...]

        # TODO(synk): nn.Dropout(p=0.1) is identity in eval mode; training-mode
        # stochastic dropout is not implemented here.
        o_ref[...] = out.astype(o_ref.dtype)

    return kernel


def continuous_value_encoder(x, w1, b1, w2, b2, gamma, beta, *,
                             max_value=512, tm=512,
                             out_dtype=jnp.float32, eps=1e-5):
    """ContinuousValueEncoder forward.  x: [B, S] -> [B, S, d_model]."""
    B, S = x.shape
    D = int(b1.shape[0])
    N = B * S

    # Effective row tile: large (overhead amortization, full MXU height) but
    # never larger than the (8-rounded) problem, and always a multiple of 8.
    tm_eff = _round_up(min(int(tm), _round_up(N, 8)), 8)
    N_pad = _round_up(N, tm_eff)
    grid = (N_pad // tm_eff,)

    x_flat = x.reshape(N, 1).astype(jnp.float32)
    if N_pad != N:
        x_flat = jnp.pad(x_flat, ((0, N_pad - N), (0, 0)))

    w1_row = w1.reshape(1, D).astype(jnp.float32)        # [D,1] -> [1,D]
    b1_row = b1.reshape(1, D).astype(jnp.float32)
    w2_t = jnp.asarray(w2, jnp.float32).T                # y = h @ w2_t
    b2_row = b2.reshape(1, D).astype(jnp.float32)
    g_row = gamma.reshape(1, D).astype(jnp.float32)
    beta_row = beta.reshape(1, D).astype(jnp.float32)

    out_itemsize = jnp.dtype(out_dtype).itemsize
    d_lanes = _round_up(D, 128)

    # VMEM budget: double-buffered x + output tiles, (double-buffered) constant
    # operands, plus f32 temporaries (h, y, out) — with ~50% headroom.
    vmem_est = (
        2 * tm_eff * 128 * 4                       # x blocks (lane-padded)
        + 2 * tm_eff * d_lanes * out_itemsize      # output blocks
        + 2 * D * d_lanes * 4                      # w2
        + 2 * 5 * 8 * d_lanes * 4                  # w1/b1/b2/gamma/beta rows
        + 4 * tm_eff * d_lanes * 4                 # in-kernel temporaries
    )
    vmem_limit = int(min(max(int(vmem_est * 1.5), 32 * 1024 * 1024),
                         64 * 1024 * 1024))

    cost = pl.CostEstimate(
        flops=2 * N_pad * D * D + 10 * N_pad * D,
        transcendentals=N_pad,                     # one rsqrt per row
        bytes_accessed=(N_pad * 4 + N_pad * D * out_itemsize
                        + D * D * 4 + 6 * D * 4),
    )

    const_spec = pl.BlockSpec((1, D), lambda i: (0, 0))
    out = pl.pallas_call(
        _make_cve_kernel(float(max_value), float(eps)),
        out_shape=jax.ShapeDtypeStruct((N_pad, D), out_dtype),
        grid_spec=pltpu.PrefetchScalarGridSpec(
            num_scalar_prefetch=0,
            grid=grid,
            in_specs=[
                pl.BlockSpec((tm_eff, 1), lambda i: (i, 0)),   # x
                const_spec,                                    # w1
                const_spec,                                    # b1
                pl.BlockSpec((D, D), lambda i: (0, 0)),        # w2_t
                const_spec,                                    # b2
                const_spec,                                    # gamma
                const_spec,                                    # beta
            ],
            out_specs=pl.BlockSpec((tm_eff, D), lambda i: (i, 0)),
        ),
        compiler_params=pltpu.CompilerParams(
            dimension_semantics=("parallel",),
            vmem_limit_bytes=vmem_limit,
        ),
        cost_estimate=cost,
    )(x_flat, w1_row, b1_row, w2_t, b2_row, g_row, beta_row)

    return out[:N].reshape(B, S, D)


def _reference(x, w1, b1, w2, b2, gamma, beta, max_value, eps=1e-5):
    xr = jnp.minimum(x[..., None].astype(jnp.float32), float(max_value))
    h = jnp.maximum(xr * w1.reshape(1, 1, -1) + b1, 0.0)
    y = jnp.einsum("bsd,ed->bse", h, w2,
                   precision=jax.lax.Precision.HIGHEST) + b2
    mu = y.mean(-1, keepdims=True)
    var = ((y - mu) ** 2).mean(-1, keepdims=True)
    return (y - mu) / jnp.sqrt(var + eps) * gamma + beta


if __name__ == "__main__":
    key = jax.random.PRNGKey(0)
    B, S, D = 2, 8, 128      # d_model multiple of 128 -> lane-dense output
    ks = jax.random.split(key, 7)

    x = jax.random.uniform(ks[0], (B, S), jnp.float32, minval=0.0, maxval=1024.0)
    w1 = jax.random.normal(ks[1], (D, 1), jnp.float32) * 0.5       # linear1.weight
    b1 = jax.random.normal(ks[2], (D,), jnp.float32) * 0.1         # linear1.bias
    w2 = jax.random.normal(ks[3], (D, D), jnp.float32) * (1.0 / D ** 0.5)
    b2 = jax.random.normal(ks[4], (D,), jnp.float32) * 0.1
    gamma = 1.0 + 0.1 * jax.random.normal(ks[5], (D,), jnp.float32)
    beta = 0.1 * jax.random.normal(ks[6], (D,), jnp.float32)

    # Case 1: small shape, f32 output, tight check.
    out = continuous_value_encoder(x, w1, b1, w2, b2, gamma, beta, max_value=512)
    jax.block_until_ready(out)
    ref = _reference(x, w1, b1, w2, b2, gamma, beta, 512)
    assert out.shape == (B, S, D)
    assert jnp.allclose(out, ref, atol=2e-3, rtol=2e-3), "f32 mismatch vs reference"

    # Case 2: N not a multiple of tm (exercises padding + multi-step grid) and
    # bf16 output (halved HBM writeback path), looser tolerance.
    B2, S2 = 4, 300
    x2 = jax.random.uniform(jax.random.PRNGKey(1), (B2, S2), jnp.float32,
                            minval=0.0, maxval=1024.0)
    out2 = continuous_value_encoder(x2, w1, b1, w2, b2, gamma, beta,
                                    max_value=512, tm=512,
                                    out_dtype=jnp.bfloat16)
    jax.block_until_ready(out2)
    ref2 = _reference(x2, w1, b1, w2, b2, gamma, beta, 512)
    assert out2.shape == (B2, S2, D)
    err = jnp.max(jnp.abs(out2.astype(jnp.float32) - ref2))
    assert float(err) < 6e-2, f"bf16 mismatch vs reference (max err {float(err)})"

    print("KERNEL_OK")
</pallas_src>

<mosaic_0001>
module attributes {stable_mosaic.version = 11 : i64} {
  func.func @kernel(%arg0: i32, %arg1: memref<16x1xf32, #tpu.memory_space<vmem>>, %arg2: memref<1x128xf32, #tpu.memory_space<vmem>>, %arg3: memref<1x128xf32, #tpu.memory_space<vmem>>, %arg4: memref<128x128xf32, #tpu.memory_space<vmem>>, %arg5: memref<1x128xf32, #tpu.memory_space<vmem>>, %arg6: memref<1x128xf32, #tpu.memory_space<vmem>>, %arg7: memref<1x128xf32, #tpu.memory_space<vmem>>, %arg8: memref<16x128xf32, #tpu.memory_space<vmem>>) attributes {dimension_semantics = [#tpu.dimension_semantics<parallel>], iteration_bounds = array<i64: 1>, scalar_prefetch = 0 : i64, scratch_operands = 0 : i64, tpu.core_type = #tpu.core_type<tc>, window_params = [{transform_indices = @transform_0, window_bounds = array<i64: 16, 1>}, {pipeline_mode = #tpu.pipeline_mode<synchronous>, transform_indices = @transform_1, window_bounds = array<i64: 1, 128>}, {pipeline_mode = #tpu.pipeline_mode<synchronous>, transform_indices = @transform_2, window_bounds = array<i64: 1, 128>}, {pipeline_mode = #tpu.pipeline_mode<synchronous>, transform_indices = @transform_3, window_bounds = array<i64: 128, 128>}, {pipeline_mode = #tpu.pipeline_mode<synchronous>, transform_indices = @transform_4, window_bounds = array<i64: 1, 128>}, {pipeline_mode = #tpu.pipeline_mode<synchronous>, transform_indices = @transform_5, window_bounds = array<i64: 1, 128>}, {pipeline_mode = #tpu.pipeline_mode<synchronous>, transform_indices = @transform_6, window_bounds = array<i64: 1, 128>}, {transform_indices = @transform_7, window_bounds = array<i64: 16, 128>}]} {
    %c0 = arith.constant 0 : index
    %c0_0 = arith.constant 0 : index
    %0 = vector.load %arg1[%c0, %c0_0] : memref<16x1xf32, #tpu.memory_space<vmem>>, vector<16x1xf32>
    %cst = arith.constant 5.120000e+02 : f32
    %1 = vector.broadcast %cst : f32 to vector<16x1xf32>
    %2 = arith.minimumf %0, %1 : vector<16x1xf32>
    %c0_1 = arith.constant 0 : index
    %c0_2 = arith.constant 0 : index
    %3 = vector.load %arg2[%c0_1, %c0_2] : memref<1x128xf32, #tpu.memory_space<vmem>>, vector<1x128xf32>
    %4 = vector.broadcast %2 : vector<16x1xf32> to vector<16x128xf32>
    %5 = vector.broadcast %3 : vector<1x128xf32> to vector<16x128xf32>
    %6 = arith.mulf %4, %5 : vector<16x128xf32>
    %c0_3 = arith.constant 0 : index
    %c0_4 = arith.constant 0 : index
    %7 = vector.load %arg3[%c0_3, %c0_4] : memref<1x128xf32, #tpu.memory_space<vmem>>, vector<1x128xf32>
    %8 = vector.broadcast %7 : vector<1x128xf32> to vector<16x128xf32>
    %9 = arith.addf %6, %8 : vector<16x128xf32>
    %cst_5 = arith.constant 0.000000e+00 : f32
    %10 = vector.broadcast %cst_5 : f32 to vector<16x128xf32>
    %11 = arith.maximumf %9, %10 : vector<16x128xf32>
    %c0_6 = arith.constant 0 : index
    %c0_7 = arith.constant 0 : index
    %12 = vector.load %arg4[%c0_6, %c0_7] : memref<128x128xf32, #tpu.memory_space<vmem>>, vector<128x128xf32>
    %cst_8 = arith.constant dense<0.000000e+00> : vector<16x128xf32>
    %13 = tpu.matmul %11, %12, %cst_8 {dimension_numbers = #tpu.dot_dimension_numbers<[1], [0], [0], [1], [0, 0, 1, 1], [], []>} : vector<16x128xf32>, vector<128x128xf32>, vector<16x128xf32> -> vector<16x128xf32>
    %c0_9 = arith.constant 0 : index
    %c0_10 = arith.constant 0 : index
    %14 = vector.load %arg5[%c0_9, %c0_10] : memref<1x128xf32, #tpu.memory_space<vmem>>, vector<1x128xf32>
    %15 = vector.broadcast %14 : vector<1x128xf32> to vector<16x128xf32>
    %16 = arith.addf %13, %15 : vector<16x128xf32>
    %cst_11 = arith.constant dense<0.000000e+00> : vector<16xf32>
    %17 = vector.multi_reduction <add>, %16, %cst_11 [1] : vector<16x128xf32> to vector<16xf32>
    %18 = vector.shape_cast %17 : vector<16xf32> to vector<16x1xf32>
    %cst_12 = arith.constant 1.280000e+02 : f32
    %19 = vector.broadcast %cst_12 : f32 to vector<16x1xf32>
    %20 = arith.divf %18, %19 : vector<16x1xf32>
    %21 = vector.broadcast %20 : vector<16x1xf32> to vector<16x128xf32>
    %22 = arith.subf %16, %21 : vector<16x128xf32>
    %23 = arith.mulf %22, %22 : vector<16x128xf32>
    %cst_13 = arith.constant dense<0.000000e+00> : vector<16xf32>
    %24 = vector.multi_reduction <add>, %23, %cst_13 [1] : vector<16x128xf32> to vector<16xf32>
    %25 = vector.shape_cast %24 : vector<16xf32> to vector<16x1xf32>
    %cst_14 = arith.constant 1.280000e+02 : f32
    %26 = vector.broadcast %cst_14 : f32 to vector<16x1xf32>
    %27 = arith.divf %25, %26 : vector<16x1xf32>
    %cst_15 = arith.constant 9.99999974E-6 : f32
    %28 = vector.broadcast %cst_15 : f32 to vector<16x1xf32>
    %29 = arith.addf %27, %28 : vector<16x1xf32>
    %30 = math.rsqrt %29 : vector<16x1xf32>
    %31 = vector.broadcast %20 : vector<16x1xf32> to vector<16x128xf32>
    %32 = arith.subf %16, %31 : vector<16x128xf32>
    %33 = vector.broadcast %30 : vector<16x1xf32> to vector<16x128xf32>
    %34 = arith.mulf %32, %33 : vector<16x128xf32>
    %c0_16 = arith.constant 0 : index
    %c0_17 = arith.constant 0 : index
    %35 = vector.load %arg6[%c0_16, %c0_17] : memref<1x128xf32, #tpu.memory_space<vmem>>, vector<1x128xf32>
    %36 = vector.broadcast %35 : vector<1x128xf32> to vector<16x128xf32>
    %37 = arith.mulf %34, %36 : vector<16x128xf32>
    %c0_18 = arith.constant 0 : index
    %c0_19 = arith.constant 0 : index
    %38 = vector.load %arg7[%c0_18, %c0_19] : memref<1x128xf32, #tpu.memory_space<vmem>>, vector<1x128xf32>
    %39 = vector.broadcast %38 : vector<1x128xf32> to vector<16x128xf32>
    %40 = arith.addf %37, %39 : vector<16x128xf32>
    %c0_20 = arith.constant 0 : index
    %c0_21 = arith.constant 0 : index
    %41 = vector.load %arg8[%c0_20, %c0_21] : memref<16x128xf32, #tpu.memory_space<vmem>>, vector<16x128xf32>
    tpu.vector_store %arg8[%c0_20, %c0_21], %40 {strides = array<i32>} : memref<16x128xf32, #tpu.memory_space<vmem>>, vector<16x128xf32>,
    return
  }
  func.func @transform_0(%arg0: i32) -> (i32, i32) {
    %c0_i32 = arith.constant 0 : i32
    %c0_i32_0 = arith.constant 0 : i32
    return %arg0, %c0_i32 : i32, i32
  }
  func.func @transform_1(%arg0: i32) -> (i32, i32) {
    %c0_i32 = arith.constant 0 : i32
    %c0_i32_0 = arith.constant 0 : i32
    %c0_i32_1 = arith.constant 0 : i32
    return %c0_i32, %c0_i32_0 : i32, i32
  }
  func.func @transform_2(%arg0: i32) -> (i32, i32) {
    %c0_i32 = arith.constant 0 : i32
    %c0_i32_0 = arith.constant 0 : i32
    %c0_i32_1 = arith.constant 0 : i32
    return %c0_i32, %c0_i32_0 : i32, i32
  }
  func.func @transform_3(%arg0: i32) -> (i32, i32) {
    %c0_i32 = arith.constant 0 : i32
    %c0_i32_0 = arith.constant 0 : i32
    %c0_i32_1 = arith.constant 0 : i32
    return %c0_i32, %c0_i32_0 : i32, i32
  }
  func.func @transform_4(%arg0: i32) -> (i32, i32) {
    %c0_i32 = arith.constant 0 : i32
    %c0_i32_0 = arith.constant 0 : i32
    %c0_i32_1 = arith.constant 0 : i32
    return %c0_i32, %c0_i32_0 : i32, i32
  }
  func.func @transform_5(%arg0: i32) -> (i32, i32) {
    %c0_i32 = arith.constant 0 : i32
    %c0_i32_0 = arith.constant 0 : i32
    %c0_i32_1 = arith.constant 0 : i32
    return %c0_i32, %c0_i32_0 : i32, i32
  }
  func.func @transform_6(%arg0: i32) -> (i32, i32) {
    %c0_i32 = arith.constant 0 : i32
    %c0_i32_0 = arith.constant 0 : i32
    %c0_i32_1 = arith.constant 0 : i32
    return %c0_i32, %c0_i32_0 : i32, i32
  }
  func.func @transform_7(%arg0: i32) -> (i32, i32) {
    %c0_i32 = arith.constant 0 : i32
    %c0_i32_0 = arith.constant 0 : i32
    return %arg0, %c0_i32 : i32, i32
  }
}

</mosaic_0001>

<bundles_post_ra>
// kernel: tpu_custom_call.1
= control target key start
LH: loop header
LB: loop body
LE: loop exit
PB: predicated region body
PF: predicated region fallthrough
CT: control target
= control target key end

     0   :  { %12 = vsyncpa [#allocation3], 0  ;;  %s359_s0 = inlined_call_operand.vmem [shape: f32[16,1], index: 0, kind: input, shape index: {}]   ;;  %s360_s1 = inlined_call_operand.vmem [shape: f32[1,128], index: 1, kind: input, shape index: {}]   ;;  %s361_s2 = inlined_call_operand.vmem [shape: f32[1,128], index: 2, kind: input, shape index: {}]   ;;  %s362_s3 = inlined_call_operand.hbm [shape: f32[128,128], index: 3, kind: input, shape index: {}]   ;;  %s363_s4 = inlined_call_operand.vmem [shape: f32[1,128], index: 4, kind: input, shape index: {}]   ;;  %s364_s5 = inlined_call_operand.vmem [shape: f32[1,128], index: 5, kind: input, shape index: {}]   ;;  %s365_s6 = inlined_call_operand.vmem [shape: f32[1,128], index: 6, kind: input, shape index: {}]   ;;  %s366_s7 = inlined_call_operand.hbm [shape: f32[16,128], index: 7, kind: output, shape index: {}]  }
   0x1   :  { %13 = vsyncpa [#allocation4], 0  ;;  %s24_s26 = sshll.u32 %s362_s3, 4  ;;  %s280_s27 = smov [#allocation2]   ;;  %s25_s26 = int_to_ptr.hbm [resolvable:$true] %s24_s26 }
   0x2   :  { %s26_s28 = sshll.u32 %s280_s27, 4  ;;  %s281_s29 = smov 128   ;;  %s27_s28 = int_to_ptr.vmem [resolvable:$true] %s26_s28 }
   0x3   :  { %s282_s30 = smov 8  }
   0x4   :  { %32 = dma.hbm_to_vmem [thread:$0]  %s25_s26, 2048, %s27_s28, [#allocation3], %s281_s29, %s281_s29, %s282_s30  }
   0x5   :  { %276 = dma.done.wait [#allocation3], 2048  }
   0x6   :  { %277 = vsyncadd [#allocation3], 4294965248  ;;  %v283_v0 = vmov 0   ;;  %v43_v1 = vld [vmem:[%s359_s0] sm:$0xff]  ;;  %v86_v2 = vld [vmem:[#allocation2 + $0x78] sm:$0xff]  ;;  %v284_v36 = vmov 128.0  }
   0x7   :  { %216 = vset.pattern.permute.xlu0 %v283_v0  ;;  %v45_v3 = vmin.f32 %v43_v1, 512.0  ;;  %91 = vmatpush.msra.mxu0 %v86_v2  ;;  %v85_v4 = vld [vmem:[#allocation2 + $0x70] sm:$0xff]  ;;  %v84_v5 = vld [vmem:[#allocation2 + $0x68] sm:$0xff]  ;;  %v83_v7 = vld [vmem:[#allocation2 + $0x60] sm:$0xff]  ;;  %222 = vrcp.f32 %v284_v36  ;;  %s285_s17 = smov [#allocation5]   ;;  %s181_s20 = sshll.u32 %s366_s7, 4  ;;  %s182_s20 = int_to_ptr.hbm [resolvable:$true] %s181_s20 }
   0x8   :  { %194 = vmatpush.msra.mxu1 %v86_v2  ;;  %v44_v6 = vld [vmem:[%s359_s0 + $0x8] sm:$0xff]  ;;  %v82_v8 = vld [vmem:[#allocation2 + $0x58] sm:$0xff]  ;;  %v81_v10 = vld [vmem:[#allocation2 + $0x50] sm:$0xff] }
   0x9   :  { %50 = vperm.xlu0 %216, %v45_v3   ;;  %92 = vmatpush.msra.mxu0 %v85_v4  ;;  %v46_v9 = vmin.f32 %v44_v6, 512.0  ;;  %v80_v11 = vld [vmem:[#allocation2 + $0x48] sm:$0xff]  ;;  %v79_v12 = vld [vmem:[#allocation2 + $0x40] sm:$0xff]  ;;  %v78_v13 = vld [vmem:[#allocation2 + $0x38] sm:$0xff] }
   0xa   :  { %195 = vmatpush.msra.mxu1 %v85_v4  ;;  %v77_v14 = vld [vmem:[#allocation2 + $0x30] sm:$0xff]  ;;  %v76_v15 = vld [vmem:[#allocation2 + $0x28] sm:$0xff]  ;;  %v75_v16 = vld [vmem:[#allocation2 + $0x20] sm:$0xff] }
   0xb   :  { %93 = vmatpush.msra.mxu0 %v84_v5  ;;  %v74_v17 = vld [vmem:[#allocation2 + $0x18] sm:$0xff]  ;;  %v73_v18 = vld [vmem:[#allocation2 + $0x10] sm:$0xff]  ;;  %v72_v19 = vld [vmem:[#allocation2 + $0x8] sm:$0xff] }
   0xc   :  { %196 = vmatpush.msra.mxu1 %v84_v5  ;;  %v71_v20 = vld [vmem:[#allocation2] sm:$0xff] }
   0xd   :  { %94 = vmatpush.msra.mxu0 %v83_v7  ;;  %v217_v21 = vld [vmem:[%s360_s1] ss:$0 sm:$0xff]  ;;  %v223_v37 = vpop.eup %222 }
   0xe   :  { %197 = vmatpush.msra.mxu1 %v83_v7  ;;  %v218_v22 = vld [vmem:[%s361_s2] ss:$0 sm:$0xff]  ;;  %v119_v38 = vmul.f32 128.0, %v223_v37  ;;  %vm123_vm0 = vweird.f32 %v223_v37 }
   0xf   :  { %95 = vmatpush.msra.mxu0 %v82_v8  ;;  %v219_v31 = vld [vmem:[%s363_s4] ss:$0 sm:$0xff] }
  0x10   :  { %198 = vmatpush.msra.mxu1 %v82_v8  ;;  %v120_v39 = vsub.f32 1.0, %v119_v38  ;;  %v220_v1 = vld [vmem:[%s364_s5] ss:$0 sm:$0xff]  ;;  %s179_s5 = sshll.u32 %s285_s17, 4  ;;  %s180_s5 = int_to_ptr.vmem [resolvable:$true] %s179_s5 }
  0x11   :  { %55 = vperm.xlu0 %216, %v46_v9   ;;  %96 = vmatpush.msra.mxu0 %v81_v10  ;;  %v221_v5 = vld [vmem:[%s365_s6] ss:$0 sm:$0xff] }
  0x12   :  { %199 = vmatpush.msra.mxu1 %v81_v10  ;;  %v121_v40 = vmul.f32 %v223_v37, %v120_v39 }
  0x13   :  { %97 = vmatpush.msra.mxu0 %v80_v11 }
  0x14   :  { %200 = vmatpush.msra.mxu1 %v80_v11  ;;  %v122_v41 = vadd.f32 %v223_v37, %v121_v40 }
  0x15   :  { %98 = vmatpush.msra.mxu0 %v79_v12 }
  0x16   :  { %201 = vmatpush.msra.mxu1 %v79_v12  ;;  %v124_v42 = vsel %vm123_vm0, %v223_v37, %v122_v41 }
  0x17   :  { %99 = vmatpush.msra.mxu0 %v78_v13 }
  0x18   :  { %202 = vmatpush.msra.mxu1 %v78_v13 }
  0x19   :  { %100 = vmatpush.msra.mxu0 %v77_v14 }
  0x1a   :  { %203 = vmatpush.msra.mxu1 %v77_v14 }
  0x1b   :  { %101 = vmatpush.msra.mxu0 %v76_v15 }
  0x1c   :  { %204 = vmatpush.msra.mxu1 %v76_v15 }
  0x1d   :  { %102 = vmatpush.msra.mxu0 %v75_v16 }
  0x1e   :  { %205 = vmatpush.msra.mxu1 %v75_v16 }
  0x1f   :  { %103 = vmatpush.msra.mxu0 %v74_v17 }
  0x20   :  { %206 = vmatpush.msra.mxu1 %v74_v17 }
  0x21   :  { %104 = vmatpush.msra.mxu0 %v73_v18 }
  0x22   :  { %207 = vmatpush.msra.mxu1 %v73_v18 }
  0x23   :  { %105 = vmatpush.msra.mxu0 %v72_v19 }
  0x24   :  { %208 = vmatpush.msra.mxu1 %v72_v19 }
  0x25   :  { %106 = vmatpush.msra.mxu0 %v71_v20 }
  0x26   :  { %209 = vmatpush.msra.mxu1 %v71_v20 }
  0x7b   :  { %v51_v23 = vpop.permute.xlu0 %50 }
  0x7c   :  { %v61_v24 = vmul.f32 %v217_v21, %v51_v23 }
  0x7e   :  { %v67_v25 = vadd.f32 %v218_v22, %v61_v24 }
  0x80   :  { %v69_v26 = vmax.f32 %v67_v25, 0.0 }
  0x82   :  { %107 = vmatmul.f32.vlgmr.msra.gmra.mxu0 %v69_v26 }
  0x83   :  { %v56_v27 = vpop.permute.xlu0 %55 }
  0x84   :  { %v62_v28 = vmul.f32 %v217_v21, %v56_v27 }
  0x86   :  { %v68_v29 = vadd.f32 %v218_v22, %v62_v28 }
  0x88   :  { %v70_v30 = vmax.f32 %v68_v29, 0.0 }
  0x8a   :  { %110 = vmatmul.f32.vlgmr.msra.gmra.mxu1 %v70_v30 }
  0xff   :  { %v108_v32 = vpop.f32.mrf.mxu0 }
 0x100   :  { %v109_v33 = vadd.f32 %v219_v31, %v108_v32 }
 0x102   :  { %114 = vadd.xlane.f32.xlu1 %v109_v33 }
 0x107   :  { %v111_v34 = vpop.f32.mrf.mxu1 }
 0x108   :  { %v112_v35 = vadd.f32 %v219_v31, %v111_v34 }
 0x10a   :  { %116 = vadd.xlane.f32.xlu1 %v112_v35 }
 0x175   :  { %v115_v43 = vpop.xlane.xlu1 %114 }
 0x176   :  { %v125_v44 = vmul.f32 %v124_v42, %v115_v43 }
 0x178   :  { %v127_v45 = vsub.f32 %v109_v33, %v125_v44 }
 0x17a   :  { %v129_v46 = vmul.f32 %v127_v45, %v127_v45 }
 0x17c   :  { %131 = vadd.xlane.f32.xlu2 %v129_v46 }
 0x17d   :  { %v117_v47 = vpop.xlane.xlu1 %116 }
 0x17e   :  { %v126_v48 = vmul.f32 %v124_v42, %v117_v47 }
 0x180   :  { %v128_v49 = vsub.f32 %v112_v35, %v126_v48 }
 0x182   :  { %v130_v50 = vmul.f32 %v128_v49, %v128_v49 }
 0x184   :  { %133 = vadd.xlane.f32.xlu2 %v130_v50 }
 0x1ef   :  { %v132_v51 = vpop.xlane.xlu2 %131 }
 0x1f0   :  { %v135_v52 = vmul.f32 %v132_v51, %v124_v42 }
 0x1f2   :  { %v137_v53 = vadd.f32 1e-05, %v135_v52 }
 0x1f4   :  { %224 = vrsqrt.f32 %v137_v53  ;;  %vm145_vm2 = vweird.f32 %v137_v53 }
 0x1f7   :  { %v134_v54 = vpop.xlane.xlu2 %133 }
 0x1f8   :  { %v136_v55 = vmul.f32 %v134_v54, %v124_v42 }
 0x1fa   :  { %v225_v56 = vpop.eup %224  ;;  %v138_v57 = vadd.f32 1e-05, %v136_v55 }
 0x1fb   :  { %v140_v58 = vmul.f32 %v225_v56, %v137_v53  ;;  %vm146_vm1 = vweird.f32 %v225_v56 }
 0x1fc   :  { %226 = vrsqrt.f32 %v138_v57  ;;  %vm147_vm3 = vmor %vm145_vm2, %vm146_vm1  ;;  %vm155_vm5 = vweird.f32 %v138_v57 }
 0x1fd   :  { %v141_v59 = vmul.f32 %v225_v56, %v140_v58 }
 0x1ff   :  { %v142_v60 = vmul.f32 0.5, %v141_v59 }
 0x201   :  { %v143_v61 = vsub.f32 1.5, %v142_v60 }
 0x202   :  { %v227_v62 = vpop.eup %226 }
 0x203   :  { %v144_v63 = vmul.f32 %v225_v56, %v143_v61  ;;  %v150_v0 = vmul.f32 %v227_v62, %v138_v57  ;;  %vm156_vm4 = vweird.f32 %v227_v62 }
 0x204   :  { %vm157_vm6 = vmor %vm155_vm5, %vm156_vm4 }
 0x205   :  { %v148_v2 = vsel %vm147_vm3, %v225_v56, %v144_v63  ;;  %v151_v3 = vmul.f32 %v227_v62, %v150_v0 }
 0x206   :  { %v159_v4 = vmul.f32 %v148_v2, %v127_v45 }
 0x207   :  { %v152_v6 = vmul.f32 0.5, %v151_v3 }
 0x208   :  { %v165_v7 = vmul.f32 %v220_v1, %v159_v4 }
 0x209   :  { %v153_v8 = vsub.f32 1.5, %v152_v6 }
 0x20a   :  { %v171_v9 = vadd.f32 %v221_v5, %v165_v7 }
 0x20b   :  { %v154_v10 = vmul.f32 %v227_v62, %v153_v8 }
 0x20c   :  { %173 = vst [vmem:[#allocation5] sm:$0xff] %v171_v9 }
 0x20d   :  { %v158_v11 = vsel %vm157_vm6, %v227_v62, %v154_v10 }
 0x20e   :  { %v160_v12 = vmul.f32 %v158_v11, %v128_v49 }
 0x210   :  { %v166_v13 = vmul.f32 %v220_v1, %v160_v12 }
 0x212   :  { %v172_v14 = vadd.f32 %v221_v5, %v166_v13 }
 0x214   :  { %174 = vst [vmem:[#allocation5 + $0x8] sm:$0xff] %v172_v14 }
 0x215   :  { %187 = dma.vmem_to_hbm [thread:$0]  %s180_s5, 256, %s182_s20, [#allocation4], %s281_s29, %s281_s29, %s282_s30  }
 0x216   :  { %278 = dma.done.wait [#allocation4], 256  }
 0x217   :  { %279 = vsyncadd [#allocation4], 4294967040 }
 0x218   :  { %192 = vsyncpa [#allocation3], 1 }
 0x219   :  { %193 = vsyncpa [#allocation4], 1 }

</bundles_post_ra>
